<compile_context>
chip_gen: v6e
topology: v6e:2x2x1
jax: 0.10.0
libtpu: 0.0.40
codegen_flags: <defaults>
</compile_context>

<pallas_src>
import jax
import jax.numpy as jnp
from jax.experimental import pallas as pl
from jax.experimental.pallas import tpu as pltpu


def _round_up(n, m):
    return ((n + m - 1) // m) * m


def linear_kernel(x_ref, wt_ref, b_ref, o_ref):
    # x_ref  : VMEM (bm, input_dim)        -- row block of the input
    # wt_ref : VMEM (input_dim, output_dim) -- W^T, resident every step
    # b_ref  : VMEM (1, output_dim)         -- bias, resident every step
    # o_ref  : VMEM (bm, output_dim)        -- row block of the output
    acc = jnp.dot(x_ref[...], wt_ref[...], preferred_element_type=jnp.float32)
    # Single vectorized store of the whole block (no per-row masked stores).
    o_ref[...] = (acc + b_ref[...]).astype(o_ref.dtype)


def linear_forward(x, weight, bias, *, block_rows=256):
    """Pallas equivalent of nn.Linear(input_dim, output_dim).forward(x)."""
    N, input_dim = x.shape
    output_dim, w_in = weight.shape
    assert w_in == input_dim, "weight / input dim mismatch"

    # Pre-transpose the weight so the kernel is a plain (bm, in) @ (in, out).
    w_t = weight.T                      # (input_dim, output_dim)
    b2 = bias.reshape(1, output_dim)    # 2-D for a clean VMEM block

    # Row tile: single grid step when N is small, row-tiled otherwise.
    bm = min(block_rows, _round_up(N, 8))
    n_pad = _round_up(N, bm)
    if n_pad != N:
        x = jnp.pad(x, ((0, n_pad - N), (0, 0)))
    grid = (n_pad // bm,)

    out = pl.pallas_call(
        linear_kernel,
        out_shape=jax.ShapeDtypeStruct((n_pad, output_dim), x.dtype),
        grid=grid,
        in_specs=[
            pl.BlockSpec((bm, input_dim), lambda i: (i, 0)),
            pl.BlockSpec((input_dim, output_dim), lambda i: (0, 0)),
            pl.BlockSpec((1, output_dim), lambda i: (0, 0)),
        ],
        out_specs=pl.BlockSpec((bm, output_dim), lambda i: (i, 0)),
        compiler_params=pltpu.CompilerParams(
            # 'parallel' only matters when there is real work to shard.
            dimension_semantics=(
                ("parallel",) if grid[0] > 1 else ("arbitrary",)
            ),
        ),
    )(x, w_t, b2)

    return out[:N]


if __name__ == "__main__":
    key = jax.random.PRNGKey(0)
    k_x, k_w, k_b = jax.random.split(key, 3)

    # Linear regression on scalar samples (spec: x = np.random.rand(500),
    # nn.Linear(input_dim, output_dim)) — kept small for the demo.
    N = 128
    input_dim = 1
    output_dim = 1

    x = jax.random.uniform(k_x, (N, input_dim), dtype=jnp.float32)
    weight = jax.random.normal(k_w, (output_dim, input_dim), dtype=jnp.float32)
    bias = jax.random.normal(k_b, (output_dim,), dtype=jnp.float32)

    out = linear_forward(x, weight, bias)
    out = jax.block_until_ready(out)

    # Reference: exactly what nn.Linear.forward computes.
    ref = x @ weight.T + bias
    assert out.shape == (N, output_dim)
    assert jnp.allclose(out, ref, atol=1e-5, rtol=1e-5), "mismatch vs reference linear"

    print("KERNEL_OK")
</pallas_src>

<mosaic_0001>
module attributes {stable_mosaic.version = 11 : i64} {
  func.func @linear_kernel(%arg0: i32, %arg1: memref<128x1xf32, #tpu.memory_space<vmem>>, %arg2: memref<1x1xf32, #tpu.memory_space<vmem>>, %arg3: memref<1x1xf32, #tpu.memory_space<vmem>>, %arg4: memref<128x1xf32, #tpu.memory_space<vmem>>) attributes {dimension_semantics = [#tpu.dimension_semantics<arbitrary>], iteration_bounds = array<i64: 1>, scalar_prefetch = 0 : i64, scratch_operands = 0 : i64, tpu.core_type = #tpu.core_type<tc>, window_params = [{transform_indices = @transform_0, window_bounds = array<i64: 128, 1>}, {pipeline_mode = #tpu.pipeline_mode<synchronous>, transform_indices = @transform_1, window_bounds = array<i64: 1, 1>}, {pipeline_mode = #tpu.pipeline_mode<synchronous>, transform_indices = @transform_2, window_bounds = array<i64: 1, 1>}, {transform_indices = @transform_3, window_bounds = array<i64: 128, 1>}]} {
    %c0 = arith.constant 0 : index
    %c0_0 = arith.constant 0 : index
    %0 = vector.load %arg1[%c0, %c0_0] : memref<128x1xf32, #tpu.memory_space<vmem>>, vector<128x1xf32>
    %c0_1 = arith.constant 0 : index
    %c0_2 = arith.constant 0 : index
    %1 = vector.load %arg2[%c0_1, %c0_2] : memref<1x1xf32, #tpu.memory_space<vmem>>, vector<1x1xf32>
    %cst = arith.constant dense<0.000000e+00> : vector<128x1xf32>
    %2 = tpu.matmul %0, %1, %cst {dimension_numbers = #tpu.dot_dimension_numbers<[1], [0], [0], [1], [0, 0, 1, 1], [], []>} : vector<128x1xf32>, vector<1x1xf32>, vector<128x1xf32> -> vector<128x1xf32>
    %c0_3 = arith.constant 0 : index
    %c0_4 = arith.constant 0 : index
    %3 = vector.load %arg3[%c0_3, %c0_4] : memref<1x1xf32, #tpu.memory_space<vmem>>, vector<1x1xf32>
    %4 = vector.broadcast %3 : vector<1x1xf32> to vector<128x1xf32>
    %5 = arith.addf %2, %4 : vector<128x1xf32>
    %c0_5 = arith.constant 0 : index
    %c0_6 = arith.constant 0 : index
    %6 = vector.load %arg4[%c0_5, %c0_6] : memref<128x1xf32, #tpu.memory_space<vmem>>, vector<128x1xf32>
    tpu.vector_store %arg4[%c0_5, %c0_6], %5 {strides = array<i32>} : memref<128x1xf32, #tpu.memory_space<vmem>>, vector<128x1xf32>,
    return
  }
  func.func @transform_0(%arg0: i32) -> (i32, i32) {
    %c0_i32 = arith.constant 0 : i32
    %c0_i32_0 = arith.constant 0 : i32
    return %arg0, %c0_i32 : i32, i32
  }
  func.func @transform_1(%arg0: i32) -> (i32, i32) {
    %c0_i32 = arith.constant 0 : i32
    %c0_i32_0 = arith.constant 0 : i32
    %c0_i32_1 = arith.constant 0 : i32
    return %c0_i32, %c0_i32_0 : i32, i32
  }
  func.func @transform_2(%arg0: i32) -> (i32, i32) {
    %c0_i32 = arith.constant 0 : i32
    %c0_i32_0 = arith.constant 0 : i32
    %c0_i32_1 = arith.constant 0 : i32
    return %c0_i32, %c0_i32_0 : i32, i32
  }
  func.func @transform_3(%arg0: i32) -> (i32, i32) {
    %c0_i32 = arith.constant 0 : i32
    %c0_i32_0 = arith.constant 0 : i32
    return %arg0, %c0_i32 : i32, i32
  }
}

</mosaic_0001>

<bundles_post_ra>
// kernel: tpu_custom_call.1
= control target key start
LH: loop header
LB: loop body
LE: loop exit
PB: predicated region body
PF: predicated region fallthrough
CT: control target
= control target key end

     0   :  { %vm42_vm0 = vcmask 7168   ;;  %vm91_vm1 = vcmask 1040384   ;;  %s477_s1 = inlined_call_operand.<no memory space> [shape: f32[1,1], index: 1, kind: input, shape index: {}]   ;;  %s478_s0 = inlined_call_operand.vmem [shape: f32[128,1], index: 0, kind: input, shape index: {}]   ;;  %s479_s2 = inlined_call_operand.<no memory space> [shape: f32[1,1], index: 2, kind: input, shape index: {}]   ;;  %s480_s3 = inlined_call_operand.vmem [shape: f32[128,1], index: 3, kind: output, shape index: {}]  }
   0x1   :  { %v8_v0 = vstv %s477_s1  ;;  %v18_v1 = vld [vmem:[%s478_s0] sm:$0xff]  ;;  %v10_v3 = vstv %s479_s2  ;;  %v19_v5 = vld [vmem:[%s478_s0 + $0x8] sm:$0xff] }
   0x2   :  { %v26_v2 = vld [vmem:[%s478_s0 + $0x40] sm:$0xff]  ;;  %9 = vst [vmem:[#allocation2] sm:$0x1] %v8_v0  ;;  %297 = vmatprep.mubr.msk.f32.mxu0 %vm42_vm0, %v18_v1  ;;  %11 = vst [vmem:[#allocation3] sm:$0x1] %v10_v3  ;;  %v27_v6 = vld [vmem:[%s478_s0 + $0x48] sm:$0xff] }
   0x3   :  { %309 = vmatprep.mubr.msk.f32.mxu1 %vm42_vm0, %v26_v2  ;;  %v20_v7 = vld [vmem:[%s478_s0 + $0x10] sm:$0xff]  ;;  %v21_v9 = vld [vmem:[%s478_s0 + $0x18] sm:$0xff]  ;;  %v22_v11 = vld [vmem:[%s478_s0 + $0x20] sm:$0xff] }
   0x4   :  { %v28_v8 = vld [vmem:[%s478_s0 + $0x50] sm:$0xff]  ;;  %v29_v10 = vld [vmem:[%s478_s0 + $0x58] sm:$0xff]  ;;  %v30_v12 = vld [vmem:[%s478_s0 + $0x60] sm:$0xff] }
   0x5   :  { %v23_v13 = vld [vmem:[%s478_s0 + $0x28] sm:$0xff]  ;;  %v24_v15 = vld [vmem:[%s478_s0 + $0x30] sm:$0xff]  ;;  %v25_v17 = vld [vmem:[%s478_s0 + $0x38] sm:$0xff] }
   0x6   :  { %v31_v14 = vld [vmem:[%s478_s0 + $0x68] sm:$0xff]  ;;  %v32_v16 = vld [vmem:[%s478_s0 + $0x70] sm:$0xff]  ;;  %v33_v18 = vld [vmem:[%s478_s0 + $0x78] sm:$0xff] }
   0x9   :  { %v34_v4 = vld [vmem:[#allocation2] sm:$0x1]  ;;  %v260_v19 = vld [vmem:[#allocation3] ss:$0 sm:$0xff] }
   0xa   :  { %295 = vmatprep.subr.msk.mxu0 %vm91_vm1, %v34_v4  ;;  %321 = vmatprep.subr.msk.mxu1 %vm91_vm1, %v34_v4 }
   0xb   :  { %296 = vmatpush3.msk.msra.mxu0 %vm91_vm1, %v34_v4  ;;  %322 = vmatpush3.msk.msra.mxu1 %vm91_vm1, %v34_v4 }
   0xc   :  { %298 = vmatmul.mubr.msk.f32.vlgmr.msra.gmra.mxu0 %vm42_vm0, %v19_v5  ;;  %310 = vmatmul.mubr.msk.f32.vlgmr.msra.gmra.mxu1 %vm42_vm0, %v27_v6 }
   0xd   :  { %300 = vmatprep.mubr.msk.f32.mxu0 %vm42_vm0, %v20_v7  ;;  %312 = vmatprep.mubr.msk.f32.mxu1 %vm42_vm0, %v28_v8 }
  0x10   :  { %301 = vmatmul.mubr.msk.f32.gmra.mxu0 %vm42_vm0, %v21_v9  ;;  %313 = vmatmul.mubr.msk.f32.gmra.mxu1 %vm42_vm0, %v29_v10 }
  0x11   :  { %303 = vmatprep.mubr.msk.f32.mxu0 %vm42_vm0, %v22_v11  ;;  %315 = vmatprep.mubr.msk.f32.mxu1 %vm42_vm0, %v30_v12 }
  0x14   :  { %304 = vmatmul.mubr.msk.f32.gmra.mxu0 %vm42_vm0, %v23_v13  ;;  %316 = vmatmul.mubr.msk.f32.gmra.mxu1 %vm42_vm0, %v31_v14 }
  0x15   :  { %306 = vmatprep.mubr.msk.f32.mxu0 %vm42_vm0, %v24_v15  ;;  %318 = vmatprep.mubr.msk.f32.mxu1 %vm42_vm0, %v32_v16 }
  0x18   :  { %307 = vmatmul.mubr.msk.f32.gmra.mxu0 %vm42_vm0, %v25_v17  ;;  %319 = vmatmul.mubr.msk.f32.gmra.mxu1 %vm42_vm0, %v33_v18 }
  0xcc   :  { %v299_v20 = vpop.f32.mrf.mxu0  ;;  %v311_v21 = vpop.f32.mrf.mxu1 }
  0xcd   :  { %v167_v22 = vadd.f32 %v299_v20, %v260_v19  ;;  %v207_v23 = vadd.f32 %v311_v21, %v260_v19 }
  0xce   :  { %v161_v24 = vpop.f32.mrf.mxu0  ;;  %v201_v25 = vpop.f32.mrf.mxu1 }
  0xcf   :  { %241 = vst.msk [vmem:[%s480_s3 + $0x8] sm:$0xff] %vm42_vm0, %v167_v22  ;;  %249 = vst.msk [vmem:[%s480_s3 + $0x48] sm:$0xff] %vm42_vm0, %v207_v23  ;;  %v162_v26 = vadd.f32 %v260_v19, %v161_v24  ;;  %v202_v27 = vadd.f32 %v260_v19, %v201_v25 }
  0xd0   :  { %v302_v28 = vpop.f32.mrf.mxu0  ;;  %v314_v29 = vpop.f32.mrf.mxu1 }
  0xd1   :  { %240 = vst.msk [vmem:[%s480_s3] sm:$0xff] %vm42_vm0, %v162_v26  ;;  %248 = vst.msk [vmem:[%s480_s3 + $0x40] sm:$0xff] %vm42_vm0, %v202_v27  ;;  %v177_v30 = vadd.f32 %v302_v28, %v260_v19  ;;  %v217_v31 = vadd.f32 %v314_v29, %v260_v19 }
  0xd2   :  { %v171_v32 = vpop.f32.mrf.mxu0  ;;  %v211_v33 = vpop.f32.mrf.mxu1 }
  0xd3   :  { %243 = vst.msk [vmem:[%s480_s3 + $0x18] sm:$0xff] %vm42_vm0, %v177_v30  ;;  %251 = vst.msk [vmem:[%s480_s3 + $0x58] sm:$0xff] %vm42_vm0, %v217_v31  ;;  %v172_v34 = vadd.f32 %v260_v19, %v171_v32  ;;  %v212_v35 = vadd.f32 %v260_v19, %v211_v33 }
  0xd4   :  { %v305_v36 = vpop.f32.mrf.mxu0  ;;  %v317_v37 = vpop.f32.mrf.mxu1 }
  0xd5   :  { %242 = vst.msk [vmem:[%s480_s3 + $0x10] sm:$0xff] %vm42_vm0, %v172_v34  ;;  %250 = vst.msk [vmem:[%s480_s3 + $0x50] sm:$0xff] %vm42_vm0, %v212_v35  ;;  %v187_v38 = vadd.f32 %v305_v36, %v260_v19  ;;  %v227_v39 = vadd.f32 %v317_v37, %v260_v19 }
  0xd6   :  { %v181_v40 = vpop.f32.mrf.mxu0  ;;  %v221_v41 = vpop.f32.mrf.mxu1 }
  0xd7   :  { %245 = vst.msk [vmem:[%s480_s3 + $0x28] sm:$0xff] %vm42_vm0, %v187_v38  ;;  %253 = vst.msk [vmem:[%s480_s3 + $0x68] sm:$0xff] %vm42_vm0, %v227_v39  ;;  %v182_v42 = vadd.f32 %v260_v19, %v181_v40  ;;  %v222_v43 = vadd.f32 %v260_v19, %v221_v41 }
  0xd8   :  { %v308_v44 = vpop.f32.mrf.mxu0  ;;  %v320_v45 = vpop.f32.mrf.mxu1 }
  0xd9   :  { %244 = vst.msk [vmem:[%s480_s3 + $0x20] sm:$0xff] %vm42_vm0, %v182_v42  ;;  %252 = vst.msk [vmem:[%s480_s3 + $0x60] sm:$0xff] %vm42_vm0, %v222_v43  ;;  %v197_v46 = vadd.f32 %v308_v44, %v260_v19  ;;  %v237_v47 = vadd.f32 %v320_v45, %v260_v19 }
  0xda   :  { %v191_v48 = vpop.f32.mrf.mxu0  ;;  %v231_v49 = vpop.f32.mrf.mxu1 }
  0xdb   :  { %247 = vst.msk [vmem:[%s480_s3 + $0x38] sm:$0xff] %vm42_vm0, %v197_v46  ;;  %255 = vst.msk [vmem:[%s480_s3 + $0x78] sm:$0xff] %vm42_vm0, %v237_v47  ;;  %v192_v50 = vadd.f32 %v260_v19, %v191_v48  ;;  %v232_v51 = vadd.f32 %v260_v19, %v231_v49 }
  0xdd   :  { %246 = vst.msk [vmem:[%s480_s3 + $0x30] sm:$0xff] %vm42_vm0, %v192_v50  ;;  %254 = vst.msk [vmem:[%s480_s3 + $0x70] sm:$0xff] %vm42_vm0, %v232_v51 }

</bundles_post_ra>
